<compile_context>
chip_gen: v7x
topology: tpu7x:2x2x1
jax: 0.10.0
libtpu: 0.0.40
codegen_flags: <defaults>
</compile_context>

<pallas_src>
import functools

import jax
import jax.numpy as jnp
from jax.experimental import pallas as pl
from jax.experimental.pallas import tpu as pltpu


def _round_up(x, m):
    return ((x + m - 1) // m) * m


def qnet_kernel(x_ref, w1_ref, b1_ref, w2_ref, b2_ref, w3_ref, b3_ref, o_ref):
    # Fused 3-layer MLP on one batch tile. Matmul inputs are bf16 (fast MXU
    # path); accumulation, bias add and ReLU stay in f32 (VPU has no bf16 on
    # v5e). x arrives in f32 and is cast here (free under MXU slack) instead
    # of in a separate XLA fusion in the wrapper.
    x = x_ref[...].astype(jnp.bfloat16)                      # (block_b, num_inputs)
    h1 = jnp.dot(x, w1_ref[...], preferred_element_type=jnp.float32) + b1_ref[...]
    h1 = jnp.maximum(h1, 0.0)
    h2 = jnp.dot(h1.astype(jnp.bfloat16), w2_ref[...],
                 preferred_element_type=jnp.float32) + b2_ref[...]
    h2 = jnp.maximum(h2, 0.0)
    out = jnp.dot(h2.astype(jnp.bfloat16), w3_ref[...],
                  preferred_element_type=jnp.float32) + b3_ref[...]
    o_ref[...] = out.astype(o_ref.dtype)                     # bf16 writeback


def prepare_params(params):
    """One-time parameter prep (call once, outside the training/inference loop).

    Casts weights to bf16 and pads the last layer out to a full 128-lane slab
    so the kernel's output store is unmasked. Biases stay f32.
    """
    w1, b1, w2, b2, w3, b3 = params
    num_actions = w3.shape[1]
    na_pad = _round_up(max(num_actions, 128), 128)
    w1_p = w1.astype(jnp.bfloat16)
    w2_p = w2.astype(jnp.bfloat16)
    w3_p = jnp.pad(w3, ((0, 0), (0, na_pad - num_actions))).astype(jnp.bfloat16)
    b3_p = jnp.pad(b3, ((0, 0), (0, na_pad - num_actions)))
    return (w1_p, b1, w2_p, b2, w3_p, b3_p)


@functools.partial(jax.jit, static_argnames=("num_actions", "block_b"))
def qnetwork_forward(x, prepped_params, num_actions, block_b=None):
    w1, b1, w2, b2, w3, b3 = prepped_params
    B, num_inputs = x.shape
    hidden = w1.shape[1]
    na_pad = w3.shape[1]

    # --- batch tiling ----------------------------------------------------
    # The kernel is grid-step-overhead bound (~0.35 us/step), so use big tiles
    # (cap 512 rows). For mid-sized batches split into (at least) two tiles so
    # the "parallel" batch axis spreads across both v7x TensorCores. Tiles are
    # multiples of 16 rows for clean bf16 (16,128) sublane layout.
    tile_cap = 512
    if block_b is None:
        b16 = _round_up(B, 16)
        if b16 <= 16:
            block_b = 16
        elif b16 <= 2 * tile_cap:
            block_b = _round_up(-(-b16 // 2), 16)
        else:
            block_b = tile_cap
    B_pad = _round_up(B, block_b)

    x_p = x if B_pad == B else jnp.pad(x, ((0, B_pad - B), (0, 0)))

    grid = (B_pad // block_b,)

    # Batch is tiled; weights/biases use constant index maps (kept resident).
    in_specs = [
        pl.BlockSpec((block_b, num_inputs), lambda i: (i, 0)),
        pl.BlockSpec((num_inputs, hidden), lambda i: (0, 0)),
        pl.BlockSpec((1, hidden), lambda i: (0, 0)),
        pl.BlockSpec((hidden, hidden), lambda i: (0, 0)),
        pl.BlockSpec((1, hidden), lambda i: (0, 0)),
        pl.BlockSpec((hidden, na_pad), lambda i: (0, 0)),
        pl.BlockSpec((1, na_pad), lambda i: (0, 0)),
    ]
    out_spec = pl.BlockSpec((block_b, na_pad), lambda i: (i, 0))

    cost = pl.CostEstimate(
        # True (unpadded) useful flops.
        flops=2 * B_pad * (num_inputs * hidden + hidden * hidden + hidden * num_actions),
        transcendentals=0,
        bytes_accessed=(
            x_p.size * 4                              # x read as f32
            + (w1.size + w2.size + w3.size) * 2       # bf16 weights
            + (b1.size + b2.size + b3.size) * 4       # f32 biases
            + B_pad * na_pad * 2                      # bf16 output writeback
        ),
    )

    out = pl.pallas_call(
        qnet_kernel,
        out_shape=jax.ShapeDtypeStruct((B_pad, na_pad), jnp.bfloat16),
        grid_spec=pltpu.PrefetchScalarGridSpec(
            num_scalar_prefetch=0,
            grid=grid,
            in_specs=in_specs,
            out_specs=out_spec,
        ),
        compiler_params=pltpu.CompilerParams(
            dimension_semantics=("parallel",),
        ),
        cost_estimate=cost,
    )(x_p, w1, b1, w2, b2, w3, b3)

    # Slice off batch/lane padding; return f32 Q-values (PyTorch semantics).
    return out[:B, :num_actions].astype(jnp.float32)


def init_params(key, num_inputs, num_actions, hidden=128):
    """Deterministic init matching nn.Linear's default: U(-1/sqrt(fan_in), 1/sqrt(fan_in))."""
    keys = jax.random.split(key, 6)

    def linear(kw, kb, fan_in, fan_out):
        bound = 1.0 / jnp.sqrt(jnp.float32(fan_in))
        w = jax.random.uniform(kw, (fan_in, fan_out), jnp.float32, -bound, bound)
        b = jax.random.uniform(kb, (1, fan_out), jnp.float32, -bound, bound)
        return w, b

    w1, b1 = linear(keys[0], keys[1], num_inputs, hidden)
    w2, b2 = linear(keys[2], keys[3], hidden, hidden)
    w3, b3 = linear(keys[4], keys[5], hidden, num_actions)
    return (w1, b1, w2, b2, w3, b3)


def reference_forward(x, params):
    # True full-f32 reference (matches the PyTorch QNetwork). The kernel uses
    # bf16 MXU inputs + bf16 output store, so compare with a bf16-level
    # tolerance rather than f32 exactness.
    w1, b1, w2, b2, w3, b3 = params
    h1 = jnp.maximum(jnp.dot(x, w1) + b1, 0.0)
    h2 = jnp.maximum(jnp.dot(h1, w2) + b2, 0.0)
    return jnp.dot(h2, w3) + b3


if __name__ == "__main__":
    key = jax.random.PRNGKey(0)
    k_x, k_p = jax.random.split(key)

    batch = 8
    num_inputs = 32
    num_actions = 8

    x = jax.random.normal(k_x, (batch, num_inputs), jnp.float32)
    params = init_params(k_p, num_inputs, num_actions)

    # One-time weight prep (bf16 cast + last-layer lane padding).
    prepped = prepare_params(params)

    out = qnetwork_forward(x, prepped, num_actions=num_actions)
    out = jax.block_until_ready(out)

    ref = reference_forward(x, params)
    assert out.shape == (batch, num_actions)
    # bf16-matmul kernel vs f32 reference: expect ~1e-2-level deviations.
    assert jnp.allclose(out, ref, atol=5e-2, rtol=5e-2), "mismatch vs JAX reference"

    print("KERNEL_OK")
</pallas_src>

<mosaic_0001>
module attributes {stable_mosaic.version = 11 : i64} {
  func.func @qnet_kernel(%arg0: i32, %arg1: memref<16x32xf32, #tpu.memory_space<vmem>>, %arg2: memref<32x128xbf16, #tpu.memory_space<vmem>>, %arg3: memref<1x128xf32, #tpu.memory_space<vmem>>, %arg4: memref<128x128xbf16, #tpu.memory_space<vmem>>, %arg5: memref<1x128xf32, #tpu.memory_space<vmem>>, %arg6: memref<128x128xbf16, #tpu.memory_space<vmem>>, %arg7: memref<1x128xf32, #tpu.memory_space<vmem>>, %arg8: memref<16x128xbf16, #tpu.memory_space<vmem>>) attributes {dimension_semantics = [#tpu.dimension_semantics<parallel>], iteration_bounds = array<i64: 1>, scalar_prefetch = 0 : i64, scratch_operands = 0 : i64, tpu.core_type = #tpu.core_type<tc>, window_params = [{transform_indices = @transform_0, window_bounds = array<i64: 16, 32>}, {pipeline_mode = #tpu.pipeline_mode<synchronous>, transform_indices = @transform_1, window_bounds = array<i64: 32, 128>}, {pipeline_mode = #tpu.pipeline_mode<synchronous>, transform_indices = @transform_2, window_bounds = array<i64: 1, 128>}, {pipeline_mode = #tpu.pipeline_mode<synchronous>, transform_indices = @transform_3, window_bounds = array<i64: 128, 128>}, {pipeline_mode = #tpu.pipeline_mode<synchronous>, transform_indices = @transform_4, window_bounds = array<i64: 1, 128>}, {pipeline_mode = #tpu.pipeline_mode<synchronous>, transform_indices = @transform_5, window_bounds = array<i64: 128, 128>}, {pipeline_mode = #tpu.pipeline_mode<synchronous>, transform_indices = @transform_6, window_bounds = array<i64: 1, 128>}, {transform_indices = @transform_7, window_bounds = array<i64: 16, 128>}]} {
    %c0 = arith.constant 0 : index
    %c0_0 = arith.constant 0 : index
    %0 = vector.load %arg1[%c0, %c0_0] : memref<16x32xf32, #tpu.memory_space<vmem>>, vector<16x32xf32>
    %1 = arith.truncf %0 : vector<16x32xf32> to vector<16x32xbf16>
    %c0_1 = arith.constant 0 : index
    %c0_2 = arith.constant 0 : index
    %2 = vector.load %arg2[%c0_1, %c0_2] : memref<32x128xbf16, #tpu.memory_space<vmem>>, vector<32x128xbf16>
    %cst = arith.constant dense<0.000000e+00> : vector<16x128xf32>
    %3 = tpu.matmul %1, %2, %cst {dimension_numbers = #tpu.dot_dimension_numbers<[1], [0], [0], [1], [0, 0, 1, 1], [], []>} : vector<16x32xbf16>, vector<32x128xbf16>, vector<16x128xf32> -> vector<16x128xf32>
    %c0_3 = arith.constant 0 : index
    %c0_4 = arith.constant 0 : index
    %4 = vector.load %arg3[%c0_3, %c0_4] : memref<1x128xf32, #tpu.memory_space<vmem>>, vector<1x128xf32>
    %5 = vector.broadcast %4 : vector<1x128xf32> to vector<16x128xf32>
    %6 = arith.addf %3, %5 : vector<16x128xf32>
    %cst_5 = arith.constant 0.000000e+00 : f32
    %7 = vector.broadcast %cst_5 : f32 to vector<16x128xf32>
    %8 = arith.maximumf %6, %7 : vector<16x128xf32>
    %9 = arith.truncf %8 : vector<16x128xf32> to vector<16x128xbf16>
    %c0_6 = arith.constant 0 : index
    %c0_7 = arith.constant 0 : index
    %10 = vector.load %arg4[%c0_6, %c0_7] : memref<128x128xbf16, #tpu.memory_space<vmem>>, vector<128x128xbf16>
    %cst_8 = arith.constant dense<0.000000e+00> : vector<16x128xf32>
    %11 = tpu.matmul %9, %10, %cst_8 {dimension_numbers = #tpu.dot_dimension_numbers<[1], [0], [0], [1], [0, 0, 1, 1], [], []>} : vector<16x128xbf16>, vector<128x128xbf16>, vector<16x128xf32> -> vector<16x128xf32>
    %c0_9 = arith.constant 0 : index
    %c0_10 = arith.constant 0 : index
    %12 = vector.load %arg5[%c0_9, %c0_10] : memref<1x128xf32, #tpu.memory_space<vmem>>, vector<1x128xf32>
    %13 = vector.broadcast %12 : vector<1x128xf32> to vector<16x128xf32>
    %14 = arith.addf %11, %13 : vector<16x128xf32>
    %cst_11 = arith.constant 0.000000e+00 : f32
    %15 = vector.broadcast %cst_11 : f32 to vector<16x128xf32>
    %16 = arith.maximumf %14, %15 : vector<16x128xf32>
    %17 = arith.truncf %16 : vector<16x128xf32> to vector<16x128xbf16>
    %c0_12 = arith.constant 0 : index
    %c0_13 = arith.constant 0 : index
    %18 = vector.load %arg6[%c0_12, %c0_13] : memref<128x128xbf16, #tpu.memory_space<vmem>>, vector<128x128xbf16>
    %cst_14 = arith.constant dense<0.000000e+00> : vector<16x128xf32>
    %19 = tpu.matmul %17, %18, %cst_14 {dimension_numbers = #tpu.dot_dimension_numbers<[1], [0], [0], [1], [0, 0, 1, 1], [], []>} : vector<16x128xbf16>, vector<128x128xbf16>, vector<16x128xf32> -> vector<16x128xf32>
    %c0_15 = arith.constant 0 : index
    %c0_16 = arith.constant 0 : index
    %20 = vector.load %arg7[%c0_15, %c0_16] : memref<1x128xf32, #tpu.memory_space<vmem>>, vector<1x128xf32>
    %21 = vector.broadcast %20 : vector<1x128xf32> to vector<16x128xf32>
    %22 = arith.addf %19, %21 : vector<16x128xf32>
    %23 = arith.truncf %22 : vector<16x128xf32> to vector<16x128xbf16>
    %c0_17 = arith.constant 0 : index
    %c0_18 = arith.constant 0 : index
    %24 = vector.load %arg8[%c0_17, %c0_18] : memref<16x128xbf16, #tpu.memory_space<vmem>>, vector<16x128xbf16>
    tpu.vector_store %arg8[%c0_17, %c0_18], %23 {strides = array<i32>} : memref<16x128xbf16, #tpu.memory_space<vmem>>, vector<16x128xbf16>,
    return
  }
  func.func @transform_0(%arg0: i32) -> (i32, i32) {
    %c0_i32 = arith.constant 0 : i32
    %c0_i32_0 = arith.constant 0 : i32
    return %arg0, %c0_i32 : i32, i32
  }
  func.func @transform_1(%arg0: i32) -> (i32, i32) {
    %c0_i32 = arith.constant 0 : i32
    %c0_i32_0 = arith.constant 0 : i32
    %c0_i32_1 = arith.constant 0 : i32
    return %c0_i32, %c0_i32_0 : i32, i32
  }
  func.func @transform_2(%arg0: i32) -> (i32, i32) {
    %c0_i32 = arith.constant 0 : i32
    %c0_i32_0 = arith.constant 0 : i32
    %c0_i32_1 = arith.constant 0 : i32
    return %c0_i32, %c0_i32_0 : i32, i32
  }
  func.func @transform_3(%arg0: i32) -> (i32, i32) {
    %c0_i32 = arith.constant 0 : i32
    %c0_i32_0 = arith.constant 0 : i32
    %c0_i32_1 = arith.constant 0 : i32
    return %c0_i32, %c0_i32_0 : i32, i32
  }
  func.func @transform_4(%arg0: i32) -> (i32, i32) {
    %c0_i32 = arith.constant 0 : i32
    %c0_i32_0 = arith.constant 0 : i32
    %c0_i32_1 = arith.constant 0 : i32
    return %c0_i32, %c0_i32_0 : i32, i32
  }
  func.func @transform_5(%arg0: i32) -> (i32, i32) {
    %c0_i32 = arith.constant 0 : i32
    %c0_i32_0 = arith.constant 0 : i32
    %c0_i32_1 = arith.constant 0 : i32
    return %c0_i32, %c0_i32_0 : i32, i32
  }
  func.func @transform_6(%arg0: i32) -> (i32, i32) {
    %c0_i32 = arith.constant 0 : i32
    %c0_i32_0 = arith.constant 0 : i32
    %c0_i32_1 = arith.constant 0 : i32
    return %c0_i32, %c0_i32_0 : i32, i32
  }
  func.func @transform_7(%arg0: i32) -> (i32, i32) {
    %c0_i32 = arith.constant 0 : i32
    %c0_i32_0 = arith.constant 0 : i32
    return %arg0, %c0_i32 : i32, i32
  }
}

</mosaic_0001>

<bundles_post_ra>
// kernel: qnetwork_forward.1
= control target key start
LH: loop header
LB: loop body
LE: loop exit
PB: predicated region body
PF: predicated region fallthrough
CT: control target
= control target key end

     0   :  { %12 = vsyncpa [#allocation3], 0  ;;  %s662_s0 = inlined_call_operand.vmem [shape: f32[16,32], index: 0, kind: input, shape index: {}]   ;;  %s663_s1 = inlined_call_operand.vmem [shape: bf16[32,128], index: 1, kind: input, shape index: {}]   ;;  %s664_s2 = inlined_call_operand.vmem [shape: f32[1,128], index: 2, kind: input, shape index: {}]   ;;  %s665_s3 = inlined_call_operand.hbm [shape: bf16[128,128], index: 3, kind: input, shape index: {}]   ;;  %s666_s4 = inlined_call_operand.vmem [shape: f32[1,128], index: 4, kind: input, shape index: {}]   ;;  %s667_s5 = inlined_call_operand.hbm [shape: bf16[128,128], index: 5, kind: input, shape index: {}]   ;;  %s668_s6 = inlined_call_operand.vmem [shape: f32[1,128], index: 6, kind: input, shape index: {}]   ;;  %s669_s7 = inlined_call_operand.vmem [shape: bf16[16,128], index: 7, kind: output, shape index: {}]  }
   0x1   :  { %13 = vsyncpa [#allocation5], 0  ;;  %s544_s24 = smov [#allocation2]   ;;  %s496_s28 = scalar_lea.hbm %s665_s3, 1024 }
   0x2   :  { %s25_s25 = sshll.u32 %s544_s24, 4  ;;  %p497_p0 = scmp.ne.s32.totalorder %s665_s3, %s496_s28  ;;  %s26_s25 = int_to_ptr.vmem [resolvable:$true] %s25_s25 }
   0x3   :  { %p500_p1 = scmp.lt.u32.totalorder %s496_s28, %s665_s3 }
   0x5   :  { %p502_p2 = pnand %p500_p1, %p497_p0 }
   0x7   :  { %505 = shalt.err (!%p502_p2)
}
   0x8   :  { %s506_s10 = scalar_lea.vmem %s26_s25, 1024  ;;  %p511_p4 = scmp.lt.s32.totalorder %s26_s25, %s26_s25 }
   0x9   :  { %p507_p3 = scmp.ne.s32.totalorder %s26_s25, %s506_s10  ;;  %p512_p5 = scmp.lt.s32.totalorder %s506_s10, %s506_s10 }
   0xb   :  { %p513_p6 = por %p512_p5, %p511_p4 }
   0xd   :  { %p514_p7 = pnand %p513_p6, %p507_p3 }
   0xf   :  { %517 = shalt.err (!%p514_p7)
}
  0x10   :  { %s545_s11 = smov 64   ;;  %s546_s12 = smov 4  }
  0x11   :  { %31 = dma.hbm_to_vmem [thread:$0]  %s665_s3, 1024, %s26_s25, [#allocation3], %s545_s11, %s545_s11, %s546_s12  }
  0x12   :  { %s547_s15 = smov [#allocation4]   ;;  %s518_s19 = scalar_lea.hbm %s667_s5, 1024 }
  0x13   :  { %s39_s16 = sshll.u32 %s547_s15, 4  ;;  %p519_p8 = scmp.ne.s32.totalorder %s667_s5, %s518_s19  ;;  %s40_s16 = int_to_ptr.vmem [resolvable:$true] %s39_s16 }
  0x14   :  { %p522_p9 = scmp.lt.u32.totalorder %s518_s19, %s667_s5 }
  0x16   :  { %p524_p10 = pnand %p522_p9, %p519_p8 }
  0x18   :  { %527 = shalt.err (!%p524_p10)
}
  0x19   :  { %s528_s24 = scalar_lea.vmem %s40_s16, 1024  ;;  %p533_p12 = scmp.lt.s32.totalorder %s40_s16, %s40_s16 }
  0x1a   :  { %p529_p11 = scmp.ne.s32.totalorder %s40_s16, %s528_s24  ;;  %p534_p13 = scmp.lt.s32.totalorder %s528_s24, %s528_s24 }
  0x1c   :  { %p535_p0 = por %p534_p13, %p533_p12 }
  0x1e   :  { %p536_p1 = pnand %p535_p0, %p529_p11 }
  0x20   :  { %539 = shalt.err (!%p536_p1)
}
  0x21   :  { %45 = dma.hbm_to_vmem [thread:$0]  %s667_s5, 1024, %s40_s16, [#allocation5], %s545_s11, %s545_s11, %s546_s12  }
  0x22   :  { %540 = dma.done.wait [#allocation3], 1024  }
  0x23   :  { %541 = vsyncadd [#allocation3], 4294966272 }
  0x24   :  { %542 = dma.done.wait [#allocation5], 1024  }
  0x25   :  { %543 = vsyncadd [#allocation5], 4294966272  ;;  %v548_v0 = vmov 0.0   ;;  %vm549_vm0 = vmmov 0   ;;  %v478_v1 = vld [vmem:[%s663_s1] sm:$0xff]   ;;  %v479_v2 = vld [vmem:[%s663_s1 + $0x8] sm:$0xff]  }
  0x26   :  { %424 = vmatprep.subr.bf16.mxu0 %v548_v0  ;;  %428 = vmatprep.mubr.msk.bf16.mxu0 %vm549_vm0, %v548_v0  ;;  %v55_v3 = vld [vmem:[%s662_s0] sm:$0xff]  ;;  %v56_v4 = vld [vmem:[%s662_s0 + $0x8] sm:$0xff]  ;;  %vm81_vm1 = vcmask 261120   ;;  %v482_v8 = vld [vmem:[#allocation2 + $0x10] sm:$0xff]  }
  0x27   :  { %432 = vmatprep.subr.bf16.mxu1 %v548_v0  ;;  %448 = vmatprep.mubr.msk.bf16.mxu1 %vm549_vm0, %v548_v0  ;;  %v480_v5 = vld [vmem:[#allocation2] sm:$0xff]   ;;  %v57_v6 = vpack.c.bf16 %v56_v4, %v55_v3  ;;  %v481_v7 = vld [vmem:[#allocation2 + $0x8] sm:$0xff]   ;;  %v483_v9 = vld [vmem:[#allocation2 + $0x18] sm:$0xff]  }
  0x28   :  { %425 = vmatpush3.bf16.msra.mxu0 %v478_v1  ;;  %433 = vmatpush3.bf16.msra.mxu1 %v480_v5  ;;  %v484_v10 = vld [vmem:[#allocation2 + $0x20] sm:$0xff]   ;;  %v485_v11 = vld [vmem:[#allocation2 + $0x28] sm:$0xff]   ;;  %v486_v12 = vld [vmem:[#allocation2 + $0x30] sm:$0xff]  }
  0x29   :  { %426 = vmatprep.subr.bf16.mxu0 %v548_v0  ;;  %434 = vmatprep.subr.bf16.mxu1 %v548_v0  ;;  %v487_v13 = vld [vmem:[#allocation2 + $0x38] sm:$0xff]   ;;  %v488_v14 = vld [vmem:[#allocation4] sm:$0xff]   ;;  %v489_v15 = vld [vmem:[#allocation4 + $0x8] sm:$0xff]  }
  0x2a   :  { %v490_v16 = vld [vmem:[#allocation4 + $0x10] sm:$0xff]   ;;  %v491_v17 = vld [vmem:[#allocation4 + $0x18] sm:$0xff]   ;;  %v492_v18 = vld [vmem:[#allocation4 + $0x20] sm:$0xff]  }
  0x2b   :  { %v493_v19 = vld [vmem:[#allocation4 + $0x28] sm:$0xff]   ;;  %v372_v20 = vld [vmem:[%s664_s2] ss:$0 sm:$0xff]  ;;  %v494_v30 = vld [vmem:[#allocation4 + $0x30] sm:$0xff]  }
  0x2c   :  { %427 = vmatpush3.bf16.msra.mxu0 %v479_v2  ;;  %435 = vmatpush3.bf16.msra.mxu1 %v481_v7  ;;  %v495_v31 = vld [vmem:[#allocation4 + $0x38] sm:$0xff]   ;;  %v376_v32 = vld [vmem:[%s666_s4] ss:$0 sm:$0xff] }
  0x2d   :  { %452 = vmatprep.subr.bf16.mxu0 %v548_v0  ;;  %436 = vmatprep.subr.bf16.mxu1 %v548_v0  ;;  %v385_v42 = vld [vmem:[%s668_s6] ss:$0 sm:$0xff] }
  0x2f   :  { %429 = vmatmul.mubr.msk.bf16.vlgmr.msra.gmra.mrb[0].mxu0 %vm81_vm1, %v57_v6 }
  0x30   :  { %468 = vmatprep.mubr.msk.bf16.mxu0 %vm549_vm0, %v548_v0  ;;  %437 = vmatpush3.bf16.msra.mxu1 %v482_v8 }
  0x31   :  { %438 = vmatprep.subr.bf16.mxu1 %v548_v0  ;;  %453 = vmatpush3.bf16.msra.mxu0 %v488_v14 }
  0x32   :  { %454 = vmatprep.subr.bf16.mxu0 %v548_v0 }
  0x34   :  { %439 = vmatpush3.bf16.msra.mxu1 %v483_v9 }
  0x35   :  { %440 = vmatprep.subr.bf16.mxu1 %v548_v0  ;;  %455 = vmatpush3.bf16.msra.mxu0 %v489_v15 }
  0x36   :  { %456 = vmatprep.subr.bf16.mxu0 %v548_v0 }
  0x38   :  { %441 = vmatpush3.bf16.msra.mxu1 %v484_v10 }
  0x39   :  { %442 = vmatprep.subr.bf16.mxu1 %v548_v0  ;;  %457 = vmatpush3.bf16.msra.mxu0 %v490_v16 }
  0x3a   :  { %458 = vmatprep.subr.bf16.mxu0 %v548_v0 }
  0x3c   :  { %443 = vmatpush3.bf16.msra.mxu1 %v485_v11 }
  0x3d   :  { %444 = vmatprep.subr.bf16.mxu1 %v548_v0  ;;  %459 = vmatpush3.bf16.msra.mxu0 %v491_v17 }
  0x3e   :  { %460 = vmatprep.subr.bf16.mxu0 %v548_v0 }
  0x40   :  { %445 = vmatpush3.bf16.msra.mxu1 %v486_v12 }
  0x41   :  { %446 = vmatprep.subr.bf16.mxu1 %v548_v0  ;;  %461 = vmatpush3.bf16.msra.mxu0 %v492_v18 }
  0x42   :  { %462 = vmatprep.subr.bf16.mxu0 %v548_v0 }
  0x44   :  { %447 = vmatpush3.bf16.msra.mxu1 %v487_v13 }
  0x45   :  { %463 = vmatpush3.bf16.msra.mxu0 %v493_v19 }
  0x46   :  { %464 = vmatprep.subr.bf16.mxu0 %v548_v0 }
  0x49   :  { %465 = vmatpush3.bf16.msra.mxu0 %v494_v30 }
  0x4a   :  { %466 = vmatprep.subr.bf16.mxu0 %v548_v0 }
  0x4d   :  { %467 = vmatpush3.bf16.msra.mxu0 %v495_v31 }
 0x102   :  { %v119_v21 = vpop.f32.mrb[0].mxu0 }
 0x103   :  { %v120_v22 = vadd.f32 %v372_v20, %v119_v21  ;;  %v430_v23 = vpop.f32.mrb[1].mxu0 }
 0x104   :  { %v122_v24 = vpop.f32.mrb[2].mxu0 }
 0x105   :  { %v123_v25 = vadd.f32 %v372_v20, %v122_v24  ;;  %v431_v26 = vpop.f32.mrb[3].mxu0  ;;  %v126_v27 = vmax.f32 %v120_v22, 0.0 }
 0x107   :  { %v127_v28 = vmax.f32 %v123_v25, 0.0 }
 0x109   :  { %v128_v29 = vpack.c.bf16 %v127_v28, %v126_v27 }
 0x10b   :  { %449 = vmatmul.mubr.bf16.vlgmr.msra.gmra.mrb[0].mxu1 %v128_v29 }
 0x1de   :  { %v234_v33 = vpop.f32.mrb[0].mxu1 }
 0x1df   :  { %v235_v34 = vadd.f32 %v376_v32, %v234_v33  ;;  %v450_v35 = vpop.f32.mrb[1].mxu1 }
 0x1e0   :  { %v237_v36 = vpop.f32.mrb[2].mxu1 }
 0x1e1   :  { %v238_v37 = vadd.f32 %v376_v32, %v237_v36  ;;  %v451_v38 = vpop.f32.mrb[3].mxu1  ;;  %v241_v39 = vmax.f32 %v235_v34, 0.0 }
 0x1e3   :  { %v242_v40 = vmax.f32 %v238_v37, 0.0 }
 0x1e5   :  { %v243_v41 = vpack.c.bf16 %v242_v40, %v241_v39 }
 0x1e7   :  { %469 = vmatmul.mubr.bf16.vlgmr.msra.gmra.mrb[4].mxu0 %v243_v41 }
 0x2ba   :  { %v349_v43 = vpop.f32.mrb[4].mxu0 }
 0x2bb   :  { %v470_v44 = vpop.f32.mrb[5].mxu0  ;;  %v350_v46 = vadd.f32 %v385_v42, %v349_v43 }
 0x2bc   :  { %v352_v45 = vpop.f32.mrb[6].mxu0 }
 0x2bd   :  { %v353_v47 = vadd.f32 %v385_v42, %v352_v45  ;;  %v471_v48 = vpop.f32.mrb[7].mxu0 }
 0x2bf   :  { %v401_v49 = vpack.c.bf16 %v353_v47, %v350_v46 }
 0x2c1   :  { %402 = vst [vmem:[%s669_s7] sm:$0xff] %v401_v49  }
 0x2c2   :  { %370 = vsyncpa [#allocation3], 1 }
 0x2c3   :  { %371 = vsyncpa [#allocation5], 1 }

</bundles_post_ra>
